<compile_context>
chip_gen: v5e
topology: v5e:2x2
jax: 0.10.0
libtpu: 0.0.40
codegen_flags: <defaults>
</compile_context>

<pallas_src>
import functools

import jax
import jax.numpy as jnp
from jax.experimental import pallas as pl
from jax.experimental.pallas import tpu as pltpu


def _dice_partial_kernel(logits_ref, labels_ref, inter_ref, card_ref, *,
                         hw, g_tile, num_classes):
    t = pl.program_id(1)

    # Zero this batch element's resident accumulators on its first pixel tile.
    @pl.when(t == 0)
    def _():
        inter_ref[...] = jnp.zeros_like(inter_ref)
        card_ref[...] = jnp.zeros_like(card_ref)

    x = logits_ref[0].astype(jnp.float32)   # (C, g_tile, 128)
    labels = labels_ref[0]                  # (1, g_tile, 128) int32

    # Validity mask: covers both the ragged last grid tile and the padded
    # tail inside the last 128-pixel lane group.
    g_iota = jax.lax.broadcasted_iota(jnp.int32, (1, g_tile, 128), 1)
    l_iota = jax.lax.broadcasted_iota(jnp.int32, (1, g_tile, 128), 2)
    pix = (t * g_tile + g_iota) * 128 + l_iota
    valid = pix < hw                        # (1, g_tile, 128) bool

    # Per-pixel softmax over the class axis (axis 0): elementwise max / sub /
    # exp / sum across the C slabs -> VPU + EUP only, no cross-lane work.
    m = jnp.max(x, axis=0, keepdims=True)
    e = jnp.exp(x - m)
    s = jnp.sum(e, axis=0, keepdims=True)
    p = e * pl.reciprocal(s, approx=True)   # (C, g_tile, 128)

    # One-hot(true) along the class axis; padded pixels contribute nothing.
    cls = jax.lax.broadcasted_iota(jnp.int32, (num_classes, g_tile, 128), 0)
    onehot = jnp.logical_and(cls == labels, valid).astype(jnp.float32)
    p = jnp.where(valid, p, 0.0)

    # Lane-wide partial sums over this tile's pixels: reduce only the sublane
    # (g_tile) axis, keep 128 lane partials per class (lane-dense store).
    inter_ref[0] += jnp.sum(p * onehot, axis=1)   # (C, 128)
    card_ref[0] += jnp.sum(p + onehot, axis=1)    # (C, 128)


def dice_loss_pallas(logits, true, eps=1e-7, pixels_per_step=32768):
    """logits: (N, C, H, W) float; true: (N, 1, H, W) integer labels."""
    N, C, H, W = logits.shape
    HW = H * W
    G = pl.cdiv(HW, 128)                    # number of 128-pixel lane groups
    HW_pad = G * 128

    # (N, C, H, W) -> (N, C, G, 128): pure minor-dim reshape, no transpose,
    # no extra HBM pass (pad only when H*W is not a multiple of 128).
    x = logits.astype(jnp.float32).reshape(N, C, HW)
    lab = true.reshape(N, 1, HW).astype(jnp.int32)
    if HW_pad != HW:
        pad = HW_pad - HW
        x = jnp.pad(x, ((0, 0), (0, 0), (0, pad)))
        lab = jnp.pad(lab, ((0, 0), (0, 0), (0, pad)))
    x = x.reshape(N, C, G, 128)
    lab = lab.reshape(N, 1, G, 128)

    # Lane-group tile (sublane axis): ~pixels_per_step pixels per grid step.
    # Keep it 8-aligned when it tiles G, or take all of G when G is small.
    # At the default (32K pixels, f32, C=4) a double-buffered logits tile is
    # ~1 MiB -- comfortably inside v7x's 32 MiB scoped VMEM as well.
    g_tile = max(1, min(pixels_per_step, HW_pad) // 128)
    g_tile = ((g_tile + 7) // 8) * 8
    if g_tile >= G:
        g_tile = G
    T = pl.cdiv(G, g_tile)

    kernel = functools.partial(_dice_partial_kernel,
                               hw=HW, g_tile=g_tile, num_classes=C)

    inter, card = pl.pallas_call(
        kernel,
        out_shape=(
            jax.ShapeDtypeStruct((N, C, 128), jnp.float32),
            jax.ShapeDtypeStruct((N, C, 128), jnp.float32),
        ),
        grid_spec=pltpu.PrefetchScalarGridSpec(
            num_scalar_prefetch=0,
            grid=(N, T),
            in_specs=[
                pl.BlockSpec((1, C, g_tile, 128), lambda b, t: (b, 0, t, 0)),
                pl.BlockSpec((1, 1, g_tile, 128), lambda b, t: (b, 0, t, 0)),
            ],
            out_specs=[
                pl.BlockSpec((1, C, 128), lambda b, t: (b, 0, 0)),
                pl.BlockSpec((1, C, 128), lambda b, t: (b, 0, 0)),
            ],
        ),
        compiler_params=pltpu.CompilerParams(
            dimension_semantics=("parallel", "arbitrary")),
    )(x, lab)

    # Final tiny reduction in plain JAX: fold the per-batch, per-lane partials.
    inter_c = jnp.sum(inter, axis=(0, 2))   # (C,)
    card_c = jnp.sum(card, axis=(0, 2))     # (C,)
    dice = 2.0 * inter_c / (card_c + eps)
    return (1.0 - jnp.mean(dice)).astype(jnp.float32)


def _dice_loss_ref(logits, true, eps=1e-7):
    """Pure-JAX reference mirroring the PyTorch module."""
    C = logits.shape[1]
    onehot = jax.nn.one_hot(true[:, 0], C, dtype=jnp.float32)        # N,H,W,C
    onehot = jnp.transpose(onehot, (0, 3, 1, 2))                     # N,C,H,W
    probas = jax.nn.softmax(logits.astype(jnp.float32), axis=1)
    dims = (0, 2, 3)
    intersection = jnp.sum(probas * onehot, axis=dims)
    cardinality = jnp.sum(probas + onehot, axis=dims)
    dice = 2.0 * intersection / (cardinality + eps)
    return 1.0 - jnp.mean(dice)


if __name__ == "__main__":
    key = jax.random.PRNGKey(0)
    k1, k2, k3, k4 = jax.random.split(key, 4)

    # Primary shape from the module spec: batch=2, classes=4, 16x16 spatial.
    N, C, H, W = 2, 4, 16, 16
    logits = jax.random.normal(k1, (N, C, H, W), dtype=jnp.float32)
    true = jax.random.randint(k2, (N, 1, H, W), 0, C, dtype=jnp.int32)

    loss = jax.block_until_ready(dice_loss_pallas(logits, true))
    ref = jax.block_until_ready(_dice_loss_ref(logits, true))
    # Tolerance relaxed vs a pure-f32 path because of pl.reciprocal(approx=True).
    assert jnp.allclose(loss, ref, atol=1e-3, rtol=1e-3), (loss, ref)

    # Ragged shape (H*W not a multiple of 128) to exercise the mask path.
    N2, C2, H2, W2 = 2, 4, 20, 20
    logits2 = jax.random.normal(k3, (N2, C2, H2, W2), dtype=jnp.float32)
    true2 = jax.random.randint(k4, (N2, 1, H2, W2), 0, C2, dtype=jnp.int32)
    loss2 = jax.block_until_ready(dice_loss_pallas(logits2, true2))
    ref2 = jax.block_until_ready(_dice_loss_ref(logits2, true2))
    assert jnp.allclose(loss2, ref2, atol=1e-3, rtol=1e-3), (loss2, ref2)

    print("KERNEL_OK")
</pallas_src>

<mosaic_0001>
module attributes {stable_mosaic.version = 11 : i64} {
  func.func @_dice_partial_kernel(%arg0: i32, %arg1: i32, %arg2: memref<1x4x2x128xf32, #tpu.memory_space<vmem>>, %arg3: memref<1x1x2x128xi32, #tpu.memory_space<vmem>>, %arg4: memref<1x4x128xf32, #tpu.memory_space<vmem>>, %arg5: memref<1x4x128xf32, #tpu.memory_space<vmem>>) attributes {dimension_semantics = [#tpu.dimension_semantics<parallel>, #tpu.dimension_semantics<arbitrary>], iteration_bounds = array<i64: 2, 1>, scalar_prefetch = 0 : i64, scratch_operands = 0 : i64, tpu.core_type = #tpu.core_type<tc>, window_params = [{transform_indices = @transform_0, window_bounds = array<i64: 1, 4, 2, 128>}, {transform_indices = @transform_1, window_bounds = array<i64: 1, 1, 2, 128>}, {transform_indices = @transform_2, window_bounds = array<i64: 1, 4, 128>}, {transform_indices = @transform_3, window_bounds = array<i64: 1, 4, 128>}]} {
    %c0_i32 = arith.constant 0 : i32
    %0 = arith.cmpi eq, %arg1, %c0_i32 : i32
    %1 = arith.extui %0 : i1 to i32
    %c0_i32_0 = arith.constant 0 : i32
    %2 = arith.cmpi ne, %1, %c0_i32_0 : i32
    scf.if %2 {
      %cst_24 = arith.constant 0.000000e+00 : f32
      %54 = vector.broadcast %cst_24 : f32 to vector<1x4x128xf32>
      %c0_25 = arith.constant 0 : index
      %c0_26 = arith.constant 0 : index
      %c0_27 = arith.constant 0 : index
      %55 = vector.load %arg4[%c0_25, %c0_26, %c0_27] : memref<1x4x128xf32, #tpu.memory_space<vmem>>, vector<1x4x128xf32>
      tpu.vector_store %arg4[%c0_25, %c0_26, %c0_27], %54 {strides = array<i32>} : memref<1x4x128xf32, #tpu.memory_space<vmem>>, vector<1x4x128xf32>,
      %cst_28 = arith.constant 0.000000e+00 : f32
      %56 = vector.broadcast %cst_28 : f32 to vector<1x4x128xf32>
      %c0_29 = arith.constant 0 : index
      %c0_30 = arith.constant 0 : index
      %c0_31 = arith.constant 0 : index
      %57 = vector.load %arg5[%c0_29, %c0_30, %c0_31] : memref<1x4x128xf32, #tpu.memory_space<vmem>>, vector<1x4x128xf32>
      tpu.vector_store %arg5[%c0_29, %c0_30, %c0_31], %56 {strides = array<i32>} : memref<1x4x128xf32, #tpu.memory_space<vmem>>, vector<1x4x128xf32>,
    } else {
    }
    %c0 = arith.constant 0 : index
    %c0_1 = arith.constant 0 : index
    %c0_2 = arith.constant 0 : index
    %c0_3 = arith.constant 0 : index
    %3 = vector.load %arg2[%c0, %c0_1, %c0_2, %c0_3] : memref<1x4x2x128xf32, #tpu.memory_space<vmem>>, vector<1x4x2x128xf32>
    %4 = vector.shape_cast %3 : vector<1x4x2x128xf32> to vector<4x2x128xf32>
    %c0_4 = arith.constant 0 : index
    %c0_5 = arith.constant 0 : index
    %c0_6 = arith.constant 0 : index
    %c0_7 = arith.constant 0 : index
    %5 = vector.load %arg3[%c0_4, %c0_5, %c0_6, %c0_7] : memref<1x1x2x128xi32, #tpu.memory_space<vmem>>, vector<1x1x2x128xi32>
    %6 = vector.shape_cast %5 : vector<1x1x2x128xi32> to vector<1x2x128xi32>
    %7 = tpu.iota {dimensions = array<i32: 1>} : vector<1x2x128xi32>
    %8 = tpu.iota {dimensions = array<i32: 2>} : vector<1x2x128xi32>
    %c2_i32 = arith.constant 2 : i32
    %9 = arith.muli %arg1, %c2_i32 : i32
    %10 = vector.broadcast %9 : i32 to vector<1x2x128xi32>
    %11 = arith.addi %10, %7 : vector<1x2x128xi32>
    %c128_i32 = arith.constant 128 : i32
    %12 = vector.broadcast %c128_i32 : i32 to vector<1x2x128xi32>
    %13 = arith.muli %11, %12 : vector<1x2x128xi32>
    %14 = arith.addi %13, %8 : vector<1x2x128xi32>
    %c256_i32 = arith.constant 256 : i32
    %15 = vector.broadcast %c256_i32 : i32 to vector<1x2x128xi32>
    %16 = arith.cmpi slt, %14, %15 : vector<1x2x128xi32>
    %cst = arith.constant dense<0xFF800000> : vector<2x128xf32>
    %17 = vector.multi_reduction <maximumf>, %4, %cst [0] : vector<4x2x128xf32> to vector<2x128xf32>
    %18 = vector.shape_cast %17 : vector<2x128xf32> to vector<1x2x128xf32>
    %19 = vector.broadcast %18 : vector<1x2x128xf32> to vector<4x2x128xf32>
    %20 = arith.subf %4, %19 : vector<4x2x128xf32>
    %21 = math.exp %20 : vector<4x2x128xf32>
    %cst_8 = arith.constant dense<0.000000e+00> : vector<2x128xf32>
    %22 = vector.multi_reduction <add>, %21, %cst_8 [0] : vector<4x2x128xf32> to vector<2x128xf32>
    %23 = vector.shape_cast %22 : vector<2x128xf32> to vector<1x2x128xf32>
    %24 = tpu.reciprocal %23 {approx = true} : vector<1x2x128xf32> -> vector<1x2x128xf32>
    %25 = vector.broadcast %24 : vector<1x2x128xf32> to vector<4x2x128xf32>
    %26 = arith.mulf %21, %25 : vector<4x2x128xf32>
    %27 = tpu.iota {dimensions = array<i32: 0>} : vector<4x2x128xi32>
    %28 = vector.broadcast %6 : vector<1x2x128xi32> to vector<4x2x128xi32>
    %29 = arith.cmpi eq, %27, %28 : vector<4x2x128xi32>
    %30 = vector.broadcast %16 : vector<1x2x128xi1> to vector<4x2x128xi1>
    %31 = arith.andi %29, %30 : vector<4x2x128xi1>
    %32 = arith.extui %31 : vector<4x2x128xi1> to vector<4x2x128xi32>
    %33 = arith.sitofp %32 : vector<4x2x128xi32> to vector<4x2x128xf32>
    %cst_9 = arith.constant 0.000000e+00 : f32
    %34 = vector.shape_cast %16 : vector<1x2x128xi1> to vector<1x2x128xi1>
    %35 = vector.broadcast %34 : vector<1x2x128xi1> to vector<4x2x128xi1>
    %36 = vector.broadcast %cst_9 : f32 to vector<4x2x128xf32>
    %37 = arith.select %35, %26, %36 : vector<4x2x128xi1>, vector<4x2x128xf32>
    %c0_10 = arith.constant 0 : index
    %c0_11 = arith.constant 0 : index
    %c0_12 = arith.constant 0 : index
    %38 = vector.load %arg4[%c0_10, %c0_11, %c0_12] : memref<1x4x128xf32, #tpu.memory_space<vmem>>, vector<1x4x128xf32>
    %39 = vector.shape_cast %38 : vector<1x4x128xf32> to vector<4x128xf32>
    %40 = arith.mulf %37, %33 : vector<4x2x128xf32>
    %cst_13 = arith.constant dense<0.000000e+00> : vector<4x128xf32>
    %41 = vector.multi_reduction <add>, %40, %cst_13 [1] : vector<4x2x128xf32> to vector<4x128xf32>
    %42 = arith.addf %39, %41 : vector<4x128xf32>
    %c0_14 = arith.constant 0 : index
    %c0_15 = arith.constant 0 : index
    %c0_16 = arith.constant 0 : index
    %43 = vector.load %arg4[%c0_14, %c0_15, %c0_16] : memref<1x4x128xf32, #tpu.memory_space<vmem>>, vector<1x4x128xf32>
    %44 = vector.shape_cast %43 : vector<1x4x128xf32> to vector<4x128xf32>
    %45 = vector.shape_cast %42 : vector<4x128xf32> to vector<1x4x128xf32>
    tpu.vector_store %arg4[%c0_14, %c0_15, %c0_16], %45 {strides = array<i32>} : memref<1x4x128xf32, #tpu.memory_space<vmem>>, vector<1x4x128xf32>,
    %c0_17 = arith.constant 0 : index
    %c0_18 = arith.constant 0 : index
    %c0_19 = arith.constant 0 : index
    %46 = vector.load %arg5[%c0_17, %c0_18, %c0_19] : memref<1x4x128xf32, #tpu.memory_space<vmem>>, vector<1x4x128xf32>
    %47 = vector.shape_cast %46 : vector<1x4x128xf32> to vector<4x128xf32>
    %48 = arith.addf %37, %33 : vector<4x2x128xf32>
    %cst_20 = arith.constant dense<0.000000e+00> : vector<4x128xf32>
    %49 = vector.multi_reduction <add>, %48, %cst_20 [1] : vector<4x2x128xf32> to vector<4x128xf32>
    %50 = arith.addf %47, %49 : vector<4x128xf32>
    %c0_21 = arith.constant 0 : index
    %c0_22 = arith.constant 0 : index
    %c0_23 = arith.constant 0 : index
    %51 = vector.load %arg5[%c0_21, %c0_22, %c0_23] : memref<1x4x128xf32, #tpu.memory_space<vmem>>, vector<1x4x128xf32>
    %52 = vector.shape_cast %51 : vector<1x4x128xf32> to vector<4x128xf32>
    %53 = vector.shape_cast %50 : vector<4x128xf32> to vector<1x4x128xf32>
    tpu.vector_store %arg5[%c0_21, %c0_22, %c0_23], %53 {strides = array<i32>} : memref<1x4x128xf32, #tpu.memory_space<vmem>>, vector<1x4x128xf32>,
    return
  }
  func.func @transform_0(%arg0: i32, %arg1: i32) -> (i32, i32, i32, i32) {
    %c0_i32 = arith.constant 0 : i32
    %c0_i32_0 = arith.constant 0 : i32
    %c0_i32_1 = arith.constant 0 : i32
    return %arg0, %c0_i32, %arg1, %c0_i32_0 : i32, i32, i32, i32
  }
  func.func @transform_1(%arg0: i32, %arg1: i32) -> (i32, i32, i32, i32) {
    %c0_i32 = arith.constant 0 : i32
    %c0_i32_0 = arith.constant 0 : i32
    %c0_i32_1 = arith.constant 0 : i32
    return %arg0, %c0_i32, %arg1, %c0_i32_0 : i32, i32, i32, i32
  }
  func.func @transform_2(%arg0: i32, %arg1: i32) -> (i32, i32, i32) {
    %c0_i32 = arith.constant 0 : i32
    %c0_i32_0 = arith.constant 0 : i32
    %c0_i32_1 = arith.constant 0 : i32
    return %arg0, %c0_i32, %c0_i32_0 : i32, i32, i32
  }
  func.func @transform_3(%arg0: i32, %arg1: i32) -> (i32, i32, i32) {
    %c0_i32 = arith.constant 0 : i32
    %c0_i32_0 = arith.constant 0 : i32
    %c0_i32_1 = arith.constant 0 : i32
    return %arg0, %c0_i32, %c0_i32_0 : i32, i32, i32
  }
}

</mosaic_0001>

<bundles_post_ra>
// kernel: tpu_custom_call.1
= control target key start
LH: loop header
LB: loop body
LE: loop exit
PB: predicated region body
PF: predicated region fallthrough
CT: control target
= control target key end

     0   :  { %9 = vsyncpa [#allocation3], 0  ;;  %s1113_s0 = inlined_call_operand.hbm [shape: f32[2,4,2,128], index: 0, kind: input, shape index: {}]   ;;  %s1114_s1 = inlined_call_operand.hbm [shape: s32[2,1,2,128], index: 1, kind: input, shape index: {}]   ;;  %s1115_s2 = inlined_call_operand.hbm [shape: f32[2,4,128], index: 2, kind: output, shape index: {0}]   ;;  %s1116_s3 = inlined_call_operand.hbm [shape: f32[2,4,128], index: 3, kind: output, shape index: {1}]  }
   0x1   :  { %11 = vsyncpa [#allocation3 + $0x1], 0 }
   0x2   :  { %12 = vsyncpa [#allocation6], 0 }
   0x3   :  { %14 = vsyncpa [#allocation6 + $0x1], 0 }
   0x4   :  { %15 = vsyncpa [#allocation4], 0 }
   0x5   :  { %17 = vsyncpa [#allocation4 + $0x1], 0 }
   0x6   :  { %18 = vsyncpa [#allocation9], 0 }
   0x7   :  { %20 = vsyncpa [#allocation9 + $0x1], 0  ;;  %s908_s12 = smov 0   ;;  %s910_s13 = smov 0  }
   0x8   :  { %s912_s14 = smov 0   ;;  %s914_s15 = smov 0  }
   0x9   :  { %s916_s16 = smov 0   ;;  %s918_s17 = smov 0  }
   0xa LB: > { %s595_s18 = sadd.s32 4294967295, %s883_s17   ;;  %s596_s19 = sadd.s32 4294967294, %s883_s17   ;;  %s883_s17 = sphi %s918_s17, %s26_s17   ;;  %s879_s16 = sphi %s916_s16, %s1126_s16   ;;  %s875_s15 = sphi %s914_s15, %s1125_s15   ;;  %s871_s14 = sphi %s912_s14, %s1124_s14   ;;  %s867_s13 = sphi %s910_s13, %s1123_s13   ;;  %s863_s12 = sphi %s908_s12, %s1122_s12  }
   0xb   : > { %s38_s20 = sadd.s32 1, %s879_s16  ;;  %s47_s21 = sadd.s32 1, %s871_s14 }
   0xc   : > { %p40_p0 = scmp.ge.s32.totalorder %s38_s20, 2  ;;  %p54_p1 = scmp.ne.s32.totalorder %s871_s14, %s867_s13 }
   0xd   : > { %p55_p2 = scmp.eq.s32.totalorder %s883_s17, 0  ;;  %p60_p3 = scmp.ne.s32.totalorder %s867_s13, %s863_s12 }
   0xe   : > { %s1128_s20 = smov (%p40_p0, %s38_s20), 0  ;;  %p61_p5 = scmp.eq.s32.totalorder %s595_s18, 0 }
   0xf   : > { %p949_p4 = por %p55_p2, %p54_p1  ;;  %s42_s23 = ssub.s32 %s879_s16, %s1128_s20 }
  0x10   : > { %p112_p6 = scmp.eq.s32.totalorder %s595_s18, 1  ;;  %p45_p7 = scmp.eq.s32.totalorder %s42_s23, 0 }
  0x11   : > { %p955_p8 = por %p61_p5, %p60_p3  ;;  %p118_p10 = scmp.eq.s32.totalorder %s596_s19, 1 }
  0x12   : > { %p959_p9 = por %p112_p6, %p54_p1  ;;  %p598_p12 = scmp.ge.s32.totalorder %s883_s17, 2 }
  0x13   : > { %s964_s26 = scalar_select %p45_p7, %s871_s14, %s47_s21  }
  0x14   : > { %p966_p11 = por %p118_p10, %p60_p3  ;;  %p642_p13 = scmp.lt.s32.totalorder %s883_s17, 2 }
  0x15   : > { %s164_s28 = sand.u32 1, %s871_s14   ;;  %s619_s30 = sshll.u32 %s879_s16, 3 }
  0x16   : > { %s599_s29 = sshll.u32 %s164_s28, 3  ;;  %s174_s6 = scalar_lea.hbm %s1113_s0, %s619_s30 }
  0x17   : > { %s168_s7 = scalar_lea.vmem [#allocation2], %s599_s29  ;;  %s175_s9 = sshll.u32 %s174_s6, 4  ;;  %s176_s9 = int_to_ptr.hbm [resolvable:$true] %s175_s9 }
  0x18   : > { %s177_s8 = sshll.u32 %s168_s7, 4  ;;  %p979_p0 = pnand %p642_p13, %p949_p4  ;;  %s178_s8 = int_to_ptr.vmem [resolvable:$true] %s177_s8 }
  0x19   : > { %p604_p1 = scmp.ge.s32.totalorder %s883_s17, 1  ;;  %s165_s11 = scalar_lea.sflag [#allocation3], %s164_s28 }
  0x1a   : > { %s885_s18 = smov 32   ;;  %s886_s19 = smov 2  }
  0x1b   : > { %631 = dma.hbm_to_vmem [thread:$0]  (!%p979_p0), %s176_s9, 128, %s178_s8, %s165_s11, %s885_s18, %s885_s18, %s886_s19  }
  0x1c   : > { %p205_p2 = scmp.lt.s32.totalorder %s883_s17, 3  ;;  %s602_s21 = sshll.u32 %s164_s28, 1 }
  0x1d   : > { %s603_s23 = sshll.u32 %s879_s16, 1  ;;  %s191_s4 = scalar_lea.vmem [#allocation5], %s602_s21 }
  0x1e   : > { %p206_p3 = pnand %p604_p1, %p205_p2  ;;  %s196_s22 = scalar_lea.hbm %s1114_s1, %s603_s23 }
  0x1f   : > { %s200_s5 = sshll.u32 %s191_s4, 4  ;;  %s198_s6 = sshll.u32 %s196_s22, 4  ;;  %s201_s5 = int_to_ptr.vmem [resolvable:$true] %s200_s5  ;;  %s199_s6 = int_to_ptr.hbm [resolvable:$true] %s198_s6 }
  0x20   : > { %s188_s7 = scalar_lea.sflag [#allocation6], %s164_s28  ;;  %209 = sbr.rel (%p206_p3) target bundleno = 114 (0x72), region = 28 }
  0x21   : > { %634 = dma.hbm_to_vmem [thread:$0]  (!%p979_p0), %s199_s6, 32, %s201_s5, %s188_s7  }
  0x22   : > { %s994_s8 = sand.u32 (!%p206_p3), 1, %s867_s13  }
  0x23   : > { %s605_s9 = sshll.u32 (!%p206_p3), %s994_s8, 3  ;;  %s212_s11 = scalar_lea.sflag (!%p206_p3), [#allocation3], %s994_s8 }
  0x24   : > { %s215_s18 = scalar_lea.vmem (!%p206_p3), [#allocation2], %s605_s9 }
  0x25   : > { %846 = dma.done.wait (%p955_p8), %s212_s11, 128  }
  0x26   : > { %848 = vsyncadd (%p955_p8), %s212_s11, 4294967168  ;;  %s606_s28 = sshll.u32 %s994_s8, 1  ;;  %s222_s10 = scalar_lea.sflag [#allocation6], %s994_s8 }
  0x27   : > { %s1004_s19 = scalar_lea.vmem [#allocation5], %s606_s28 }
  0x28   : > { %850 = dma.done.wait (%p955_p8), %s222_s10, 32  }
  0x29   : > { %852 = vsyncadd (%p955_p8), %s222_s10, 4294967264  ;;  %s607_s21 = sshll.u32 %s994_s8, 2  ;;  %v887_v0 = vmov 0.0   ;;  %vm280_vm0 = vcmask 1041408   ;;  %v265_v1 = vld [vmem:[%s215_s18] sm:$0x3]  ;;  %v270_v12 = vlaneseq }
  0x2a   : > { %s1011_s23 = scalar_lea.vmem [#allocation7], %s607_s21  ;;  %s1014_s29 = scalar_lea.vmem [#allocation8], %s607_s21  ;;  %v266_v2 = vld [vmem:[%s215_s18 + $0x2] sm:$0x3]  ;;  %v267_v3 = vld [vmem:[%s215_s18 + $0x4] sm:$0x3] }
  0x2b   : > { %263 = vst [vmem:[%s1011_s23] sm:$0xf] %v887_v0  ;;  %v268_v4 = vld [vmem:[%s215_s18 + $0x6] sm:$0x3]  ;;  %v281_v5 = vsel %vm280_vm0, %v265_v1, -inf  ;;  %v282_v6 = vsel %vm280_vm0, %v266_v2, -inf  ;;  %v283_v7 = vsel %vm280_vm0, %v267_v3, -inf }
  0x2c   : > { %264 = vst [vmem:[%s1014_s29] sm:$0xf] %v887_v0  ;;  %v284_v8 = vsel %vm280_vm0, %v268_v4, -inf  ;;  %v285_v9 = vmax.f32 %v281_v5, %v282_v6  ;;  %v271_v21 = vshrl.u32 %v270_v12, 7  ;;  %v273_v22 = vand.u32 127, %v270_v12  ;;  %v269_v31 = vld [vmem:[%s1004_s19] sm:$0x3] }
  0x2d   : > { %v286_v10 = vmax.f32 %v283_v7, %v284_v8  ;;  %vm312_vm2 = vcmp.eq.s32.totalorder %v269_v31, 0  ;;  %vm313_vm3 = vcmp.eq.s32.totalorder %v269_v31, 1  ;;  %vm314_vm4 = vcmp.eq.s32.totalorder %v269_v31, 2  ;;  %s615_s24 = sshll.u32 %s875_s15, 2  ;;  %s441_s7 = sshll.u32 %s1011_s23, 4  ;;  %s442_s7 = int_to_ptr.vmem [resolvable:$true] %s441_s7 }
  0x2e   : > { %v277_v23 = vmul.u32 128, %v271_v21  ;;  %vm315_vm5 = vcmp.eq.s32.totalorder %v269_v31, 3  ;;  %vm371_vm10 = vcmask 1041409   ;;  %vm373_vm11 = vcmask 1042434   ;;  %s439_s4 = scalar_lea.hbm %s1115_s2, %s615_s24  ;;  %s453_s6 = scalar_lea.hbm %s1116_s3, %s615_s24 }
  0x2f   : > { %v287_v11 = vmax.f32 %v285_v9, %v286_v10  ;;  %vm375_vm12 = vcmask 1043459   ;;  %s443_s9 = sshll.u32 %s439_s4, 4  ;;  %s455_s11 = sshll.u32 %s1014_s29, 4  ;;  %s444_s9 = int_to_ptr.hbm [resolvable:$true] %s443_s9  ;;  %s1060_s11 = int_to_ptr.vmem [resolvable:$true] %s455_s11 }
  0x30   : > { %v278_v28 = vadd.s32 %v277_v23, %v273_v22  ;;  %s457_s18 = sshll.u32 %s453_s6, 4  ;;  %s424_s28 = scalar_lea.sflag [#allocation4], %s994_s8  ;;  %s1062_s18 = int_to_ptr.hbm [resolvable:$true] %s457_s18 }
  0x31   : > { %v288_v13 = vsub.f32 %v265_v1, %v287_v11  ;;  %v289_v14 = vsub.f32 %v266_v2, %v287_v11  ;;  %v290_v15 = vsub.f32 %v267_v3, %v287_v11  ;;  %v291_v16 = vsub.f32 %v268_v4, %v287_v11  ;;  %s779_s10 = sshra.s32 %s444_s9, 4  ;;  %s785_s30 = scalar_lea.hbm %s1115_s2, 8  ;;  %s780_s10 = int_to_ptr.hbm [resolvable:$true] %s779_s10 }
  0x32   : > { %vm279_vm1 = vcmp.lt.s32.totalorder %v278_v28, 256  ;;  %s781_s19 = scalar_lea.hbm %s780_s10, 4  ;;  %p786_p7 = scmp.lt.s32.totalorder %s780_s10, %s1115_s2 }
  0x33   : > { %v292_v17 = vmul.f32 1.442695, %v288_v13  ;;  %v294_v18 = vmul.f32 1.442695, %v289_v14  ;;  %v296_v19 = vmul.f32 1.442695, %v290_v15  ;;  %vm318_vm6 = vmand %vm312_vm2, %vm279_vm1  ;;  %p782_p4 = scmp.ne.s32.totalorder %s780_s10, %s781_s19  ;;  %p787_p8 = scmp.lt.s32.totalorder %s785_s30, %s781_s19 }
  0x34   : > { %v298_v20 = vmul.f32 1.442695, %v291_v16  ;;  %vm319_vm7 = vmand %vm313_vm3, %vm279_vm1  ;;  %v609_v38 = vsel %vm318_vm6, 1.0, %v887_v0 }
  0x35   : > { %695 = vpow2.f32 %v292_v17  ;;  %vm320_vm8 = vmand %vm314_vm4, %vm279_vm1  ;;  %v610_v39 = vsel %vm319_vm7, 1.0, %v887_v0  ;;  %p783_p5 = pnand %p782_p4, %p959_p9  ;;  %p788_p10 = por %p787_p8, %p786_p7 }
  0x36   : > { %697 = vpow2.f32 %v294_v18  ;;  %vm321_vm9 = vmand %vm315_vm5, %vm279_vm1  ;;  %v611_v40 = vsel %vm320_vm8, 1.0, %v887_v0 }
  0x37   : > { %699 = vpow2.f32 %v296_v19  ;;  %v612_v41 = vsel %vm321_vm9, 1.0, %v887_v0  ;;  %p784_p6 = pneg %p783_p5 }
  0x38   : > { %701 = vpow2.f32 %v298_v20 }
  0x39   : > { %p789_p13 = pnand %p788_p10, %p784_p6 }
  0x3b   : > { %v696_v24 = vpop.eup %695 }
  0x3c   : > { %v698_v25 = vpop.eup %697  ;;  %v300_v26 = vsel %vm280_vm0, %v696_v24, 0.0 }
  0x3d   : > { %v700_v27 = vpop.eup %699  ;;  %v301_v29 = vsel %vm280_vm0, %v698_v25, 0.0 }
  0x3e   : > { %v702_v30 = vpop.eup %701  ;;  %v302_v32 = vadd.f32 %v301_v29, %v300_v26  ;;  %v303_v33 = vsel %vm280_vm0, %v700_v27, 0.0 }
  0x3f   : > { %v305_v34 = vsel %vm280_vm0, %v702_v30, 0.0 }
  0x40   : > { %v304_v35 = vadd.f32 %v303_v33, %v302_v32 }
  0x42   : > { %v306_v36 = vadd.f32 %v305_v34, %v304_v35 }
  0x44   : > { %703 = vrcp.f32 %v306_v36 }
  0x4a   : > { %v704_v37 = vpop.eup %703 }
  0x4b   : > { %v308_v42 = vmul.f32 %v704_v37, %v696_v24  ;;  %v309_v43 = vmul.f32 %v704_v37, %v698_v25  ;;  %v310_v44 = vmul.f32 %v704_v37, %v700_v27  ;;  %v311_v45 = vmul.f32 %v704_v37, %v702_v30 }
  0x4d   : > { %v330_v46 = vsel %vm279_vm1, %v308_v42, 0.0  ;;  %v331_v47 = vsel %vm279_vm1, %v309_v43, 0.0  ;;  %v332_v48 = vsel %vm279_vm1, %v310_v44, 0.0  ;;  %v333_v49 = vsel %vm279_vm1, %v311_v45, 0.0 }
  0x4e   : > { %v335_v50 = vmul.f32 %v609_v38, %v330_v46  ;;  %v336_v51 = vmul.f32 %v610_v39, %v331_v47  ;;  %v337_v52 = vmul.f32 %v611_v40, %v332_v48  ;;  %v338_v53 = vmul.f32 %v612_v41, %v333_v49 }
  0x4f   : > { %v381_v54 = vadd.f32 %v609_v38, %v330_v46  ;;  %v382_v55 = vadd.f32 %v610_v39, %v331_v47  ;;  %v383_v56 = vadd.f32 %v611_v40, %v332_v48  ;;  %v384_v57 = vadd.f32 %v612_v41, %v333_v49  ;;  %v334_v46 = vld [vmem:[%s1011_s23] sm:$0xf] }
  0x50   : > { %v339_v58 = vsel %vm280_vm0, %v335_v50, 0.0  ;;  %v346_v59 = vsel %vm280_vm0, %v336_v51, 0.0  ;;  %v353_v60 = vsel %vm280_vm0, %v337_v52, 0.0  ;;  %v360_v61 = vsel %vm280_vm0, %v338_v53, 0.0 }
  0x51   : > { %v340_v62 = vrot.slane %v339_v58, 4  ;;  %v347_v63 = vrot.slane %v346_v59, 4  ;;  %v385_v0 = vsel %vm280_vm0, %v381_v54, 0.0  ;;  %v392_v1 = vsel %vm280_vm0, %v382_v55, 0.0 }
  0x52   : > { %v386_v2 = vrot.slane %v385_v0, 4  ;;  %v393_v3 = vrot.slane %v392_v1, 4  ;;  %v354_v4 = vrot.slane %v353_v60, 4  ;;  %v361_v5 = vrot.slane %v360_v61, 4 }
  0x53   : > { %v341_v6 = vadd.f32 %v340_v62, %v339_v58  ;;  %v348_v7 = vadd.f32 %v347_v63, %v346_v59  ;;  %v399_v8 = vsel %vm280_vm0, %v383_v56, 0.0  ;;  %v406_v9 = vsel %vm280_vm0, %v384_v57, 0.0  ;;  %v380_v56 = vld [vmem:[%s1014_s29] sm:$0xf] }
  0x54   : > { %v355_v10 = vadd.f32 %v354_v4, %v353_v60  ;;  %v362_v11 = vadd.f32 %v361_v5, %v360_v61  ;;  %v387_v12 = vadd.f32 %v386_v2, %v385_v0  ;;  %v394_v13 = vadd.f32 %v393_v3, %v392_v1 }
  0x55   : > { %v342_v14 = vrot.slane %v341_v6, 2  ;;  %v349_v15 = vrot.slane %v348_v7, 2  ;;  %v400_v16 = vrot.slane %v399_v8, 4  ;;  %v407_v17 = vrot.slane %v406_v9, 4 }
  0x56   : > { %v356_v18 = vrot.slane %v355_v10, 2  ;;  %v363_v19 = vrot.slane %v362_v11, 2  ;;  %v388_v20 = vrot.slane %v387_v12, 2  ;;  %v395_v21 = vrot.slane %v394_v13, 2 }
  0x57   : > { %v343_v22 = vadd.f32 %v342_v14, %v341_v6  ;;  %v350_v23 = vadd.f32 %v349_v15, %v348_v7  ;;  %v401_v24 = vadd.f32 %v400_v16, %v399_v8  ;;  %v408_v25 = vadd.f32 %v407_v17, %v406_v9 }
  0x58   : > { %v357_v26 = vadd.f32 %v356_v18, %v355_v10  ;;  %v364_v27 = vadd.f32 %v363_v19, %v362_v11  ;;  %v389_v28 = vadd.f32 %v388_v20, %v387_v12  ;;  %v396_v29 = vadd.f32 %v395_v21, %v394_v13 }
  0x59   : > { %v344_v30 = vrot.slane %v343_v22, 1  ;;  %v351_v31 = vrot.slane %v350_v23, 1  ;;  %v402_v32 = vrot.slane %v401_v24, 2  ;;  %v409_v33 = vrot.slane %v408_v25, 2 }
  0x5a   : > { %v358_v34 = vrot.slane %v357_v26, 1  ;;  %v365_v35 = vrot.slane %v364_v27, 1  ;;  %v390_v36 = vrot.slane %v389_v28, 1  ;;  %v397_v37 = vrot.slane %v396_v29, 1 }
  0x5b   : > { %v345_v38 = vadd.f32 %v344_v30, %v343_v22  ;;  %v352_v39 = vadd.f32 %v351_v31, %v350_v23  ;;  %v403_v40 = vadd.f32 %v402_v32, %v401_v24  ;;  %v410_v41 = vadd.f32 %v409_v33, %v408_v25 }
  0x5c   : > { %v359_v42 = vadd.f32 %v358_v34, %v357_v26  ;;  %v366_v43 = vadd.f32 %v365_v35, %v364_v27  ;;  %v391_v44 = vadd.f32 %v390_v36, %v389_v28  ;;  %v398_v45 = vadd.f32 %v397_v37, %v396_v29 }
  0x5d   : > { %v372_v47 = vsel %vm371_vm10, %v352_v39, %v345_v38  ;;  %v404_v48 = vrot.slane %v403_v40, 1  ;;  %v411_v49 = vrot.slane %v410_v41, 1 }
  0x5e   : > { %v374_v50 = vsel %vm373_vm11, %v359_v42, %v372_v47  ;;  %v417_v51 = vsel %vm371_vm10, %v398_v45, %v391_v44 }
  0x5f   : > { %v376_v52 = vsel %vm375_vm12, %v366_v43, %v374_v50  ;;  %v405_v53 = vadd.f32 %v404_v48, %v403_v40  ;;  %v412_v54 = vadd.f32 %v411_v49, %v410_v41 }
  0x60   : > { %v378_v55 = vadd.f32 %v376_v52, %v334_v46 }
  0x61   : > { %v418_v57 = vsel %vm373_vm11, %v405_v53, %v417_v51 }
  0x62   : > { %379 = vst [vmem:[%s1011_s23] sm:$0xf] %v378_v55  ;;  %v419_v58 = vsel %vm375_vm12, %v412_v54, %v418_v57 }
  0x63   : > { %v421_v59 = vadd.f32 %v419_v58, %v380_v56 }
  0x64   : > { %792 = shalt.err (!%p789_p13)
}
  0x65   : > { %624 = dma.vmem_to_hbm [thread:$0]  (%p959_p9), %s442_s7, 64, %s444_s9, %s424_s28   ;;  %422 = vst [vmem:[%s1014_s29] sm:$0xf] %v421_v59 }
  0x66   : > { %s429_s4 = scalar_lea.sflag [#allocation9], %s994_s8  ;;  %s807_s15 = sshra.s32 %s1062_s18, 4  ;;  %s808_s15 = int_to_ptr.hbm [resolvable:$true] %s807_s15 }
  0x67   : > { %s809_s5 = scalar_lea.hbm %s808_s15, 4  ;;  %s813_s19 = scalar_lea.hbm %s1116_s3, 8 }
  0x68   : > { %p810_p0 = scmp.ne.s32.totalorder %s808_s15, %s809_s5  ;;  %p814_p3 = scmp.lt.s32.totalorder %s808_s15, %s1116_s3 }
  0x69   : > { %p815_p4 = scmp.lt.s32.totalorder %s813_s19, %s809_s5 }
  0x6a   : > { %p811_p1 = pnand %p810_p0, %p959_p9 }
  0x6b   : > { %p816_p5 = por %p815_p4, %p814_p3 }
  0x6c   : > { %p812_p2 = pneg %p811_p1 }
  0x6e   : > { %p817_p6 = pnand %p816_p5, %p812_p2 }
  0x70   : > { %820 = shalt.err (!%p817_p6)
}
  0x71   : > { %625 = dma.vmem_to_hbm [thread:$0]  (%p959_p9), %s1060_s11, 64, %s1062_s18, %s429_s4  }
  0x72 PF: > { %s469_s8 = sand.u32 1, %s863_s12   ;;  %p636_p7 = pnand %p598_p12, %p966_p11 }
  0x73   : > { %s470_s29 = scalar_lea.sflag [#allocation4], %s469_s8 }
  0x74   : > { %p637_p8 = pneg %p636_p7 }
  0x76   : > { %854 = dma.done.wait (%p637_p8), %s470_s29, 64  }
  0x77   : > { %856 = vsyncadd (%p637_p8), %s470_s29, 4294967232  ;;  %s480_s7 = scalar_lea.sflag [#allocation9], %s469_s8 }
  0x78   : > { %858 = dma.done.wait (%p637_p8), %s480_s7, 64  }
  0x79   : > { %860 = vsyncadd (%p637_p8), %s480_s7, 4294967232  ;;  %s26_s17 = sadd.s32 1, %s883_s17   ;;  %s1122_s12 = smov %s867_s13 }
  0x7a   : > { %p23_p10 = scmp.ge.s32.totalorder %s26_s17, 4   ;;  %s1123_s13 = smov %s871_s14 }
  0x7b   : > { %s1124_s14 = smov %s964_s26  ;;  %s1125_s15 = smov %s879_s16 }
  0x7c   : > { %s1126_s16 = smov %s1128_s20  ;;  %25 = sbr.rel (!%p23_p10) target bundleno = 10 (0xa), region = 107 }
  0x81   :  { %486 = vsyncpa [#allocation3], 1 }
  0x82   :  { %488 = vsyncpa [#allocation3 + $0x1], 1 }
  0x83   :  { %489 = vsyncpa [#allocation6], 1 }
  0x84   :  { %491 = vsyncpa [#allocation6 + $0x1], 1 }
  0x85   :  { %492 = vsyncpa [#allocation4], 1 }
  0x86   :  { %494 = vsyncpa [#allocation4 + $0x1], 1 }
  0x87   :  { %495 = vsyncpa [#allocation9], 1 }
  0x88   :  { %497 = vsyncpa [#allocation9 + $0x1], 1 }

</bundles_post_ra>
